<compile_context>
chip_gen: v6e
topology: v6e:2x2x1
jax: 0.10.0
libtpu: 0.0.40
codegen_flags: <defaults>
</compile_context>

<pallas_src>
import jax
import jax.numpy as jnp
from jax.experimental import pallas as pl
from jax.experimental.pallas import tpu as pltpu


def _sse_kernel(x_ref, w_ref, b_ref, o_ref):
    # x_ref / o_ref: (C, THW) VMEM blocks (leading N dim squeezed away).
    # w_ref: (C, 1) VMEM; b_ref: (1, 1) SMEM scalar.
    x = x_ref[...]                                                      # (C, THW)
    # 1x1 conv over channels: per-pixel weighted sum over C + bias.
    s = jnp.sum(x * w_ref[...], axis=0, keepdims=True) + b_ref[0, 0]    # (1, THW)
    e = jax.nn.sigmoid(s)                                               # (1, THW)
    o_ref[...] = x * e                                                  # broadcast over C


def _round_up(v, m):
    return ((v + m - 1) // m) * m


def _vmem_budget():
    """Per-generation (target bytes per single tile buffer, scoped VMEM limit)."""
    try:
        cap = pltpu.get_tpu_info().vmem_capacity_bytes
    except Exception:  # pragma: no cover - fall back to the most conservative gen
        cap = 64 * 1024 * 1024
    if cap <= 80 * 1024 * 1024:
        # v7x: 64 MiB/TC physical -> 8 MiB tiles, 48 MiB scoped limit (headroom).
        return 8 * 1024 * 1024, 48 * 1024 * 1024
    # v5e / v6e: 128 MiB physical -> 8 MiB tiles, 64 MiB scoped limit.
    return 8 * 1024 * 1024, 64 * 1024 * 1024


def _pick_hw_tile(C, HW128, N, dtype_bytes, target_buffer_bytes):
    """Lane-tile width: multiple of 128, accounts for sublane-padded C and the
    4x buffering factor (2x in + 2x out), and keeps >= ~8 grid steps total."""
    c_pad = _round_up(C, 8)  # f32 sublane padding
    # target_buffer_bytes is the budget for ONE tile buffer; peak ~= 4 of them.
    max_lanes = (target_buffer_bytes // (c_pad * dtype_bytes)) // 128 * 128
    max_lanes = max(128, max_lanes)
    thw = min(HW128, max_lanes)
    thw = max(128, (thw // 128) * 128)
    # Cap tile size so the pipeline has enough steps to overlap DMA with compute
    # (and the v7x megacore has something to split).
    min_total_steps = 8
    while N * pl.cdiv(HW128, thw) < min_total_steps and thw > 128:
        thw = max(128, ((thw // 2) // 128) * 128)
    return thw


def sse_forward(x_nchw, weight, bias):
    """x_nchw: (N, C, H, W) float32; weight: (C,) 1x1-conv weight; bias: () conv bias."""
    N, C, H, W = x_nchw.shape
    HW = H * W
    dtype_bytes = jnp.dtype(x_nchw.dtype).itemsize

    target_buf, vmem_limit = _vmem_budget()
    HW128 = _round_up(HW, 128)
    thw = _pick_hw_tile(C, HW128, N, dtype_bytes, target_buf)
    HW_pad = _round_up(HW, thw)          # multiple of thw (and of 128): all tiles full
    num_hw_tiles = HW_pad // thw

    x_flat = x_nchw.reshape(N, C, HW)
    if HW_pad != HW:
        x_flat = jnp.pad(x_flat, ((0, 0), (0, 0), (0, HW_pad - HW)))

    w2d = weight.reshape(C, 1).astype(jnp.float32)
    b2d = bias.reshape(1, 1).astype(jnp.float32)

    out_flat = pl.pallas_call(
        _sse_kernel,
        out_shape=jax.ShapeDtypeStruct((N, C, HW_pad), x_flat.dtype),
        grid_spec=pltpu.PrefetchScalarGridSpec(
            num_scalar_prefetch=0,
            grid=(num_hw_tiles, N),
            in_specs=[
                pl.BlockSpec((pl.Squeezed(), C, thw), lambda h, n: (n, 0, h)),
                pl.BlockSpec((C, 1), lambda h, n: (0, 0)),
                pl.BlockSpec(memory_space=pltpu.MemorySpace.SMEM),
            ],
            out_specs=pl.BlockSpec((pl.Squeezed(), C, thw), lambda h, n: (n, 0, h)),
        ),
        compiler_params=pltpu.CompilerParams(
            dimension_semantics=("parallel", "parallel"),
            vmem_limit_bytes=vmem_limit,
        ),
    )(x_flat, w2d, b2d)

    return out_flat[:, :, :HW].reshape(N, C, H, W)


def sse_reference(x_nchw, weight, bias):
    # Pure-JAX reference of the PyTorch forward (1x1 conv -> sigmoid -> multiply).
    s = jnp.einsum("nchw,c->nhw", x_nchw, weight) + bias
    e = jax.nn.sigmoid(s)[:, None, :, :]
    return x_nchw * e


if __name__ == "__main__":
    key = jax.random.PRNGKey(0)
    kx, kw, kb = jax.random.split(key, 3)

    N, C, H, W = 2, 4, 16, 16
    x = jax.random.normal(kx, (N, C, H, W), dtype=jnp.float32)

    # Deterministic synthetic Conv2d(C, 1, 1) parameters (kaiming-uniform-like bound).
    bound = 1.0 / (C ** 0.5)
    weight = jax.random.uniform(kw, (C,), minval=-bound, maxval=bound, dtype=jnp.float32)
    bias = jax.random.uniform(kb, (), minval=-bound, maxval=bound, dtype=jnp.float32)

    out = jax.block_until_ready(sse_forward(x, weight, bias))
    ref = sse_reference(x, weight, bias)

    assert out.shape == (N, C, H, W)
    assert jnp.allclose(out, ref, atol=1e-5, rtol=1e-5)
    print("KERNEL_OK")
</pallas_src>

<mosaic_0001>
module attributes {stable_mosaic.version = 11 : i64} {
  func.func @_sse_kernel(%arg0: i32, %arg1: i32, %arg2: memref<1x4x128xf32, #tpu.memory_space<vmem>>, %arg3: memref<4x1xf32, #tpu.memory_space<vmem>>, %arg4: memref<1x1xf32, #tpu.memory_space<smem>>, %arg5: memref<1x4x128xf32, #tpu.memory_space<vmem>>) attributes {dimension_semantics = [#tpu.dimension_semantics<parallel>, #tpu.dimension_semantics<parallel>], iteration_bounds = array<i64: 2, 2>, scalar_prefetch = 0 : i64, scratch_operands = 0 : i64, tpu.core_type = #tpu.core_type<tc>, window_params = [{transform_indices = @transform_0, window_bounds = array<i64: 1, 4, 128>}, {pipeline_mode = #tpu.pipeline_mode<synchronous>, transform_indices = @transform_1, window_bounds = array<i64: 4, 1>}, {transform_indices = @transform_2, window_bounds = array<i64: 1, 1>}, {transform_indices = @transform_3, window_bounds = array<i64: 1, 4, 128>}]} {
    %c0 = arith.constant 0 : index
    %c0_0 = arith.constant 0 : index
    %c0_1 = arith.constant 0 : index
    %0 = vector.load %arg2[%c0, %c0_0, %c0_1] : memref<1x4x128xf32, #tpu.memory_space<vmem>>, vector<1x4x128xf32>
    %1 = vector.shape_cast %0 : vector<1x4x128xf32> to vector<4x128xf32>
    %c0_2 = arith.constant 0 : index
    %c0_3 = arith.constant 0 : index
    %2 = vector.load %arg3[%c0_2, %c0_3] : memref<4x1xf32, #tpu.memory_space<vmem>>, vector<4x1xf32>
    %3 = vector.broadcast %2 : vector<4x1xf32> to vector<4x128xf32>
    %4 = arith.mulf %1, %3 : vector<4x128xf32>
    %cst = arith.constant dense<0.000000e+00> : vector<128xf32>
    %5 = vector.multi_reduction <add>, %4, %cst [0] : vector<4x128xf32> to vector<128xf32>
    %6 = vector.shape_cast %5 : vector<128xf32> to vector<1x128xf32>
    %c0_4 = arith.constant 0 : index
    %c0_5 = arith.constant 0 : index
    %7 = memref.load %arg4[%c0_4, %c0_5] : memref<1x1xf32, #tpu.memory_space<smem>>
    %8 = vector.broadcast %7 : f32 to vector<1x128xf32>
    %9 = arith.addf %6, %8 : vector<1x128xf32>
    %10 = arith.negf %9 : vector<1x128xf32>
    %11 = math.exp %10 : vector<1x128xf32>
    %cst_6 = arith.constant 1.000000e+00 : f32
    %12 = vector.broadcast %cst_6 : f32 to vector<1x128xf32>
    %13 = arith.addf %12, %11 : vector<1x128xf32>
    %14 = arith.divf %12, %13 : vector<1x128xf32>
    %15 = vector.broadcast %14 : vector<1x128xf32> to vector<4x128xf32>
    %16 = arith.mulf %1, %15 : vector<4x128xf32>
    %c0_7 = arith.constant 0 : index
    %c0_8 = arith.constant 0 : index
    %c0_9 = arith.constant 0 : index
    %17 = vector.load %arg5[%c0_7, %c0_8, %c0_9] : memref<1x4x128xf32, #tpu.memory_space<vmem>>, vector<1x4x128xf32>
    %18 = vector.shape_cast %17 : vector<1x4x128xf32> to vector<4x128xf32>
    %19 = vector.shape_cast %16 : vector<4x128xf32> to vector<1x4x128xf32>
    tpu.vector_store %arg5[%c0_7, %c0_8, %c0_9], %19 {strides = array<i32>} : memref<1x4x128xf32, #tpu.memory_space<vmem>>, vector<1x4x128xf32>,
    return
  }
  func.func @transform_0(%arg0: i32, %arg1: i32) -> (i32, i32, i32) {
    %c0_i32 = arith.constant 0 : i32
    %c0_i32_0 = arith.constant 0 : i32
    return %arg1, %c0_i32, %arg0 : i32, i32, i32
  }
  func.func @transform_1(%arg0: i32, %arg1: i32) -> (i32, i32) {
    %c0_i32 = arith.constant 0 : i32
    %c0_i32_0 = arith.constant 0 : i32
    %c0_i32_1 = arith.constant 0 : i32
    return %c0_i32, %c0_i32_0 : i32, i32
  }
  func.func @transform_2(%arg0: i32, %arg1: i32) -> (i32, i32) {
    %c0_i32 = arith.constant 0 : i32
    %c0_i32_0 = arith.constant 0 : i32
    %c0_i32_1 = arith.constant 0 : i32
    return %c0_i32, %c0_i32_0 : i32, i32
  }
  func.func @transform_3(%arg0: i32, %arg1: i32) -> (i32, i32, i32) {
    %c0_i32 = arith.constant 0 : i32
    %c0_i32_0 = arith.constant 0 : i32
    return %arg1, %c0_i32, %arg0 : i32, i32, i32
  }
}

</mosaic_0001>

<bundles_post_ra>
// kernel: tpu_custom_call.1
= control target key start
LH: loop header
LB: loop body
LE: loop exit
PB: predicated region body
PF: predicated region fallthrough
CT: control target
= control target key end

     0   :  { %s748_s0 = inlined_call_operand.hbm [shape: f32[2,4,256], index: 0, kind: input, shape index: {}]   ;;  %s749_s1 = inlined_call_operand.vmem [shape: f32[4,1], index: 1, kind: input, shape index: {}]   ;;  %s750_s2 = inlined_call_operand.<no memory space> [shape: f32[1,1], index: 2, kind: input, shape index: {}]   ;;  %s751_s3 = inlined_call_operand.hbm [shape: f32[2,4,256], index: 3, kind: output, shape index: {}]  }
   0x1   :  { %8 = sst [smem:[#allocation2]] %s750_s2 }
   0x2   :  { %9 = vsyncpa [#allocation4], 0 }
   0x3   :  { %11 = vsyncpa [#allocation4 + $0x1], 0 }
   0x4   :  { %12 = vsyncpa [#allocation5], 0 }
   0x5   :  { %14 = vsyncpa [#allocation5 + $0x1], 0  ;;  %s585_s14 = smov 0   ;;  %s587_s15 = smov 0  }
   0x6   :  { %s589_s16 = smov 0   ;;  %s591_s17 = smov 0  }
   0x7   :  { %s593_s18 = smov 0   ;;  %s595_s19 = smov 0  }
   0x8   :  { %s597_s20 = smov 0   ;;  %s599_s21 = smov 0  }
   0x9 LB: > { %s333_s2 = sadd.s32 4294967295, %s557_s21   ;;  %s334_s22 = sadd.s32 4294967294, %s557_s21   ;;  %s557_s21 = sphi %s599_s21, %s20_s21   ;;  %s553_s20 = sphi %s597_s20, %s764_s20   ;;  %s549_s19 = sphi %s595_s19, %s763_s19   ;;  %s545_s18 = sphi %s593_s18, %s762_s18   ;;  %s541_s17 = sphi %s591_s17, %s761_s17   ;;  %s537_s16 = sphi %s589_s16, %s760_s16   ;;  %s533_s15 = sphi %s587_s15, %s759_s15   ;;  %s529_s14 = sphi %s585_s14, %s758_s14  }
   0xa   : > { %s29_s23 = sadd.s32 1, %s549_s19  ;;  %s32_s24 = sadd.s32 1, %s553_s20 }
   0xb   : > { %p30_p0 = scmp.ge.s32.totalorder %s29_s23, 2  ;;  %s41_s25 = sadd.s32 1, %s537_s16 }
   0xc   : > { %p48_p1 = scmp.ne.s32.totalorder %s537_s16, %s533_s15  ;;  %p49_p2 = scmp.eq.s32.totalorder %s557_s21, 0 }
   0xd   : > { %s766_s23 = smov (%p30_p0, %s29_s23), 0  ;;  %s768_s24 = smov (!%p30_p0, %s32_s24), %s553_s20 }
   0xe   : > { %s36_s26 = ssub.s32 %s549_s19, %s766_s23  ;;  %p638_p3 = por %p49_p2, %p48_p1 }
   0xf   : > { %p34_p4 = scmp.ge.s32.totalorder %s768_s24, 2  ;;  %p54_p5 = scmp.ne.s32.totalorder %s533_s15, %s529_s14 }
  0x10   : > { %p55_p6 = scmp.eq.s32.totalorder %s333_s2, 0  ;;  %p122_p7 = scmp.eq.s32.totalorder %s333_s2, 3 }
  0x11   : > { %s770_s24 = smov (%p34_p4, %s768_s24), 0  ;;  %p128_p10 = scmp.eq.s32.totalorder %s334_s22, 3 }
  0x12   : > { %p646_p8 = por %p55_p6, %p54_p5  ;;  %p650_p9 = por %p122_p7, %p48_p1 }
  0x13   : > { %s37_s30 = ssub.s32 %s553_s20, %s770_s24  ;;  %p656_p12 = por %p128_p10, %p54_p5 }
  0x14   : > { %s38_s4 = sor.u32 %s37_s30, %s36_s26  ;;  %p361_p13 = scmp.lt.s32.totalorder %s557_s21, 4 }
  0x15   : > { %p39_p11 = scmp.eq.s32.totalorder %s38_s4, 0  ;;  %s154_s6 = sand.u32 1, %s537_s16  }
  0x16   : > { %s755_s5 = scalar_select %p656_p12, 1, 0 }
  0x17   : > { %s663_s7 = scalar_select %p39_p11, %s537_s16, %s41_s25  }
  0x18   : > { %s337_s8 = sshll.u32 %s154_s6, 2  ;;  %s338_s9 = sshll.u32 %s549_s19, 1 }
  0x19   : > { %s163_s10 = sadd.s32 %s553_s20, %s338_s9  ;;  %s158_s11 = scalar_lea.vmem [#allocation3], %s337_s8 }
  0x1a   : > { %s167_s12 = sshll.u32 %s158_s11, 4  ;;  %s339_s13 = sshll.u32 %s163_s10, 6  ;;  %s168_s12 = int_to_ptr.vmem [resolvable:$true] %s167_s12 }
  0x1b   : > { %s165_s26 = scalar_lea.hbm %s748_s0, %s339_s13  ;;  %p672_p0 = pnand %p361_p13, %p638_p3 }
  0x1c   : > { %p340_p1 = scmp.ge.s32.totalorder %s557_s21, 1  ;;  %p172_p2 = scmp.lt.s32.totalorder %s557_s21, 5 }
  0x1d   : > { %s155_s25 = scalar_lea.sflag [#allocation4], %s154_s6  ;;  %p435_p4 = pneg %p672_p0 }
  0x1e   : > { %s446_s4 = scalar_lea.vmem %s168_s12, 64  ;;  %s559_s8 = smov [#allocation3]  }
  0x1f   : > { %p447_p5 = scmp.ne.s32.totalorder %s168_s12, %s446_s4  ;;  %s451_s9 = sshll.u32 %s559_s8, 4  ;;  %s452_s9 = int_to_ptr.vmem [resolvable:$false] %s451_s9 }
  0x20   : > { %s453_s10 = scalar_lea.vmem %s452_s9, 128  ;;  %p454_p10 = scmp.lt.s32.totalorder %s168_s12, %s452_s9 }
  0x21   : > { %p449_p6 = pnand %p447_p5, %p435_p4  ;;  %p455_p11 = scmp.lt.s32.totalorder %s453_s10, %s446_s4 }
  0x23   : > { %p450_p7 = pneg %p449_p6  ;;  %p456_p3 = por %p455_p11, %p454_p10 }
  0x25   : > { %p457_p13 = pnand %p456_p3, %p450_p7 }
  0x27   : > { %460 = shalt.err (!%p457_p13)
}
  0x28   : > { %356 = dma.hbm_to_vmem [thread:$0]  (!%p672_p0), %s165_s26, 64, %s168_s12, %s155_s25  }
  0x29   : > { %p173_p12 = pnand %p340_p1, %p172_p2 }
  0x2a   : > { %s687_s27 = sand.u32 (!%p173_p12), 1, %s533_s15  }
  0x2b   : > { %176 = sbr.rel (%p173_p12) target bundleno = 239 (0xef), region = 32  ;;  %s341_s6 = sshll.u32 (!%p173_p12), %s687_s27, 2 }
  0x2c   : > { %s179_s11 = scalar_lea.sflag (!%p173_p12), [#allocation4], %s687_s27  ;;  %s182_s13 = scalar_lea.vmem (!%p173_p12), [#allocation3], %s341_s6 }
  0x30   : > { %520 = dma.done.wait (%p646_p8), %s179_s11, 64  }
  0x31   : > { %522 = vsyncadd (%p646_p8), %s179_s11, 4294967232  ;;  %v560_v0 = vmov 0   ;;  %v206_v1 = vld [vmem:[%s749_s1] sm:$0xf]  ;;  %vm213_vm0 = vcmask 1043456   ;;  %s221_s22 = sld [smem:[#allocation2]] }
  0x32   : > { %428 = vset.pattern.permute.xlu0 %v560_v0  ;;  %v205_v2 = vld [vmem:[%s182_s13] sm:$0xf]  ;;  %s345_s28 = sshll.u32 %s541_s17, 1  ;;  %s204_s25 = scalar_lea.vmem [#allocation6], %s341_s6 }
  0x33   : > { %209 = vperm.xlu0 %428, %v206_v1   ;;  %s244_s26 = sadd.s32 %s545_s18, %s345_s28  ;;  %s248_s4 = sshll.u32 %s204_s25, 4  ;;  %s249_s4 = int_to_ptr.vmem [resolvable:$true] %s248_s4 }
  0x34   : > { %s346_s30 = sshll.u32 %s244_s26, 6  ;;  %s233_s11 = scalar_lea.sflag [#allocation5], %s687_s27 }
  0x35   : > { %s246_s10 = scalar_lea.hbm %s751_s3, %s346_s30  ;;  %s461_s13 = scalar_lea.vmem %s249_s4, 64 }
  0x36   : > { %p462_p8 = scmp.ne.s32.totalorder %s249_s4, %s461_s13  ;;  %s561_s17 = smov [#allocation6]  }
  0x37   : > { %v222_v11 = vstv %s221_s22  ;;  %s465_s18 = sshll.u32 %s561_s17, 4  ;;  %s466_s18 = int_to_ptr.vmem [resolvable:$false] %s465_s18 }
  0x38   : > { %p463_p12 = pnand %p462_p8, %p650_p9  ;;  %s467_s12 = scalar_lea.vmem %s466_s18, 128 }
  0x39   : > { %p468_p1 = scmp.lt.s32.totalorder %s249_s4, %s466_s18  ;;  %p469_p2 = scmp.lt.s32.totalorder %s467_s12, %s461_s13 }
  0x3a   : > { %p464_p0 = pneg %p463_p12 }
  0x3b   : > { %p470_p4 = por %p469_p2, %p468_p1 }
  0x3d   : > { %p471_p5 = pnand %p470_p4, %p464_p0 }
  0xae   : > { %v210_v3 = vpop.permute.xlu0 %209 }
  0xaf   : > { %v212_v4 = vmul.f32 %v210_v3, %v205_v2 }
  0xb1   : > { %v214_v5 = vsel %vm213_vm0, %v212_v4, 0.0 }
  0xb2   : > { %v215_v6 = vrot.slane %v214_v5, 4 }
  0xb4   : > { %v216_v7 = vadd.f32 %v215_v6, %v214_v5 }
  0xb6   : > { %v217_v8 = vrot.slane %v216_v7, 2 }
  0xb8   : > { %v218_v9 = vadd.f32 %v217_v8, %v216_v7 }
  0xba   : > { %v219_v10 = vrot.slane %v218_v9, 1 }
  0xbc   : > { %v220_v12 = vadd.f32 %v219_v10, %v218_v9 }
  0xbe   : > { %v223_v13 = vadd.f32 %v222_v11, %v220_v12 }
  0xc0   : > { %v343_v14 = vmul.f32 -1.442695, %v223_v13 }
  0xc2   : > { %429 = vpow2.f32 %v343_v14 }
  0xcf   : > { %v430_v15 = vpop.eup %429 }
  0xd0   : > { %v227_v16 = vadd.f32 1.0, %v430_v15 }
  0xd2   : > { %431 = vrcp.f32 %v227_v16 }
  0xdf   : > { %v432_v17 = vpop.eup %431 }
  0xe0   : > { %v230_v18 = vmul.f32 %v432_v17, %v205_v2 }
  0xe2   : > { %231 = vst [vmem:[%s204_s25] sm:$0xf] %v230_v18 }
  0xe3   : > { %474 = shalt.err (!%p471_p5)
}
  0xe4   : > { %s475_s6 = scalar_lea.hbm %s246_s10, 64  ;;  %s479_s22 = scalar_lea.hbm %s751_s3, 256 }
  0xe5   : > { %p476_p6 = scmp.ne.s32.totalorder %s246_s10, %s475_s6  ;;  %p480_p11 = scmp.lt.s32.totalorder %s246_s10, %s751_s3 }
  0xe6   : > { %p481_p3 = scmp.lt.s32.totalorder %s479_s22, %s475_s6 }
  0xe7   : > { %p477_p7 = pnand %p476_p6, %p650_p9 }
  0xe8   : > { %p482_p13 = por %p481_p3, %p480_p11 }
  0xe9   : > { %p478_p10 = pneg %p477_p7 }
  0xeb   : > { %p483_p8 = pnand %p482_p13, %p478_p10 }
  0xed   : > { %486 = shalt.err (!%p483_p8)
}
  0xee   : > { %351 = dma.vmem_to_hbm [thread:$0]  (%p650_p9), %s249_s4, 64, %s246_s10, %s233_s11  }
  0xef PF: > { %p362_p12 = scmp.ge.s32.totalorder %s557_s21, 2  ;;  %s260_s30 = sand.u32 1, %s529_s14  }
  0xf0   : > { %p757_p0 = scmp.ne.s32.totalorder %s755_s5, 0  ;;  %s261_s25 = scalar_lea.sflag [#allocation5], %s260_s30 }
  0xf2   : > { %p358_p1 = pnand %p362_p12, %p757_p0 }
  0xf4   : > { %p359_p2 = pneg %p358_p1 }
  0xf6   : > { %524 = dma.done.wait (%p359_p2), %s261_s25, 64  }
  0xf7   : > { %526 = vsyncadd (%p359_p2), %s261_s25, 4294967232  ;;  %s20_s21 = sadd.s32 1, %s557_s21   ;;  %s758_s14 = smov %s533_s15 }
  0xf8   : > { %p17_p4 = scmp.ge.s32.totalorder %s20_s21, 6   ;;  %s759_s15 = smov %s537_s16 }
  0xf9   : > { %s760_s16 = smov %s663_s7  ;;  %s761_s17 = smov %s549_s19 }
  0xfa   : > { %s762_s18 = smov %s553_s20  ;;  %s763_s19 = smov %s766_s23 }
  0xfb   : > { %s764_s20 = smov %s770_s24  ;;  %19 = sbr.rel (!%p17_p4) target bundleno = 9 (0x9), region = 77 }
 0x100   :  { %266 = vsyncpa [#allocation4], 1 }
 0x101   :  { %268 = vsyncpa [#allocation4 + $0x1], 1 }
 0x102   :  { %269 = vsyncpa [#allocation5], 1 }
 0x103   :  { %271 = vsyncpa [#allocation5 + $0x1], 1 }

</bundles_post_ra>
